<compile_context>
chip_gen: v7x
topology: tpu7x:2x2x1
jax: 0.10.0
libtpu: 0.0.40
codegen_flags: <defaults>
</compile_context>

<pallas_src>
import functools

import jax
import jax.numpy as jnp
from jax.experimental import pallas as pl
from jax.experimental.pallas import tpu as pltpu

_MAX_ROWS = 512                        # 512 x 512 f32 block = 1 MiB
_LANE_WIDTHS = (512, 384, 256, 128)    # preferred lane-dense slab widths


def _cdiv(a, b):
    return -(-a // b)


def _round_up(x, m):
    return _cdiv(x, m) * m


def _smooth_l1(pred, target, beta):
    diff = jnp.abs(pred.astype(jnp.float32) - target.astype(jnp.float32))
    if beta > 0:
        inv_2beta = 0.5 / beta          # precomputed: no per-element divide
        half_beta = 0.5 * beta
        return jnp.where(diff < beta, diff * diff * inv_2beta, diff - half_beta)
    return diff


def _sum_kernel(*refs, beta, has_weight, tm, total_rows, need_mask, fold8):
    """Accumulate per-core partial sums into a resident (1, acc_rows, C) block."""
    if has_weight:
        pred_ref, tgt_ref, w_ref, out_ref = refs
    else:
        pred_ref, tgt_ref, out_ref = refs
        w_ref = None

    c = pl.program_id(0)   # core-split axis ('parallel')
    i = pl.program_id(1)   # reduction axis   ('arbitrary')

    @pl.when(i == 0)
    def _():
        out_ref[...] = jnp.zeros_like(out_ref)

    loss = _smooth_l1(pred_ref[...], tgt_ref[...], beta)
    if has_weight:
        # (tm, C) or compact (tm, 1) weight; the latter lane-broadcasts.
        loss = loss * w_ref[...].astype(jnp.float32)

    if need_mask:
        # Unclamped logical row range of this step: zeroes partial-edge rows
        # and fully-duplicated (clamped) blocks on the core-split axis.
        row0 = (c * pl.num_programs(1) + i) * tm
        rows = row0 + jax.lax.broadcasted_iota(jnp.int32, loss.shape, 0)
        loss = jnp.where(rows < total_rows, loss, 0.0)

    if fold8:
        # (tm, C) -> (tm//8, 8, C) sum over axis 0: pure vreg-wise VALU adds,
        # keeps the resident accumulator at 8 sublanes (16 KiB for C=512).
        partial = loss.reshape(tm // 8, 8, loss.shape[-1]).sum(axis=0)
    else:
        partial = loss
    out_ref[...] += partial[None]


def _elementwise_kernel(*refs, beta, scale, has_weight):
    if has_weight:
        pred_ref, tgt_ref, w_ref, out_ref = refs
    else:
        pred_ref, tgt_ref, out_ref = refs
        w_ref = None
    loss = _smooth_l1(pred_ref[...], tgt_ref[...], beta)
    if has_weight:
        loss = loss * w_ref[...].astype(jnp.float32)
    out_ref[...] = (loss * scale).astype(out_ref.dtype)


class LinesL1Loss:
    """JAX/Pallas port of the PyTorch LinesL1Loss module (forward pass)."""

    def __init__(self, reduction="mean", loss_weight=1.0, beta=0.5,
                 min_pallas_numel=16384, max_rows=_MAX_ROWS):
        self.reduction = reduction
        self.loss_weight = float(loss_weight)
        self.beta = float(beta)
        self.min_pallas_numel = int(min_pallas_numel)
        self.max_rows = int(max_rows)

    # ---- plain-jnp fast path (tiny inputs: launch overhead dominates) ----
    def _jnp_path(self, pred, target, weight, reduction, avg_factor, num_points):
        loss = _smooth_l1(pred, target, self.beta)
        if weight is not None:
            loss = loss * weight.astype(jnp.float32)
        scale = jnp.float32(self.loss_weight / num_points)
        if reduction == "none":
            return (loss * scale).astype(pred.dtype)
        s = loss.sum()
        if reduction == "mean":
            denom = pred.size if avg_factor is None else avg_factor
            s = s / jnp.asarray(denom, jnp.float32)
        return s * scale

    def __call__(self, pred, target, weight=None, avg_factor=None,
                 reduction_override=None):
        assert reduction_override in (None, "none", "mean", "sum")
        reduction = reduction_override if reduction_override else self.reduction
        if avg_factor is not None and reduction == "sum":
            # mmdet raises in this configuration; match it.
            raise ValueError('avg_factor can not be used with reduction="sum"')

        num_points = pred.shape[-1] // 2
        total = int(pred.size)
        last_dim = int(pred.shape[-1])

        # Normalize an mmdet-style per-line weight (..., P) -> (..., P, 1).
        if weight is not None and tuple(weight.shape) == tuple(pred.shape[:-1]):
            weight = weight[..., None]

        if total < self.min_pallas_numel:
            return self._jnp_path(pred, target, weight, reduction, avg_factor,
                                  num_points)

        # ---- weight classification (avoid materializing broadcasts) ----
        if weight is None:
            w_kind = "none"
        elif tuple(weight.shape) == tuple(pred.shape):
            w_kind = "full"
        elif tuple(weight.shape) == tuple(pred.shape[:-1]) + (1,):
            w_kind = "row"      # per-line weight, broadcast along the last dim
        else:
            # TODO(synk): other broadcast patterns are materialized (one extra
            # HBM stream); stream them compactly if they show up in practice.
            weight = jnp.broadcast_to(weight, pred.shape)
            w_kind = "full"
        has_w = w_kind != "none"

        # ---- layout: metadata-only reshape to a 2-D (R, C) slab ----
        if w_kind == "row":
            C = last_dim        # compact (R, 1) weight requires row == line
        else:
            C = last_dim
            for w in _LANE_WIDTHS:
                if total % w == 0:
                    C = w
                    break
        R = total // C

        operands = [pred.reshape(R, C), target.reshape(R, C)]
        wC = 1 if w_kind == "row" else C
        if has_w:
            operands.append(weight.reshape(R, wC))

        # ---- row tiling: balanced tiles, dtype-aware sublane granularity ----
        sub = {1: 32, 2: 16}.get(jnp.dtype(pred.dtype).itemsize, 8)
        if R <= self.max_rows:
            tm = R                                   # full extent: always legal
        else:
            tm = _round_up(_cdiv(R, _cdiv(R, self.max_rows)), sub)
        grid_r = _cdiv(R, tm)

        if reduction == "none":
            scale = self.loss_weight / num_points
            blk = pl.BlockSpec((tm, C), lambda i: (i, 0))
            in_specs = [blk, blk]
            if has_w:
                in_specs.append(pl.BlockSpec((tm, wC), lambda i: (i, 0)))
            out = pl.pallas_call(
                functools.partial(_elementwise_kernel, beta=self.beta,
                                  scale=scale, has_weight=has_w),
                out_shape=jax.ShapeDtypeStruct((R, C), pred.dtype),
                grid=(grid_r,),
                in_specs=in_specs,
                out_specs=blk,
                compiler_params=pltpu.CompilerParams(
                    dimension_semantics=("parallel",)),
            )(*operands)
            return out.reshape(pred.shape)           # metadata-only

        # ---- 'mean' / 'sum': 2-core split + resident partial-sum blocks ----
        n_cores = 2 if grid_r >= 2 else 1
        steps = _cdiv(grid_r, n_cores)
        need_mask = (R % tm != 0) or (n_cores * steps != grid_r)
        fold8 = (tm % 8 == 0)
        acc_rows = 8 if fold8 else tm
        last_blk = grid_r - 1

        def data_map(c, i):
            # Clamp so duplicated steps re-read the last valid block (their
            # contribution is zeroed by the in-kernel row mask).
            return (jnp.minimum(c * steps + i, last_blk), 0)

        blk = pl.BlockSpec((tm, C), data_map)
        in_specs = [blk, blk]
        if has_w:
            in_specs.append(pl.BlockSpec((tm, wC), data_map))

        partials = pl.pallas_call(
            functools.partial(_sum_kernel, beta=self.beta, has_weight=has_w,
                              tm=tm, total_rows=R, need_mask=need_mask,
                              fold8=fold8),
            out_shape=jax.ShapeDtypeStruct((n_cores, acc_rows, C), jnp.float32),
            grid=(n_cores, steps),
            in_specs=in_specs,
            out_specs=pl.BlockSpec((1, acc_rows, C), lambda c, i: (c, 0, 0)),
            compiler_params=pltpu.CompilerParams(
                dimension_semantics=("parallel", "arbitrary")),
        )(*operands)

        total_sum = jnp.sum(partials)   # tiny (n_cores, 8, C) f32 reduce in XLA

        if reduction == "mean":
            denom = float(total) if avg_factor is None else avg_factor
            loss = total_sum / jnp.asarray(denom, jnp.float32)
        else:   # 'sum'
            loss = total_sum
        return loss / jnp.float32(num_points) * jnp.float32(self.loss_weight)


def _reference(pred, target, weight, beta, reduction, loss_weight, avg_factor=None):
    diff = jnp.abs(pred.astype(jnp.float32) - target.astype(jnp.float32))
    if beta > 0:
        elem = jnp.where(diff < beta, 0.5 * diff * diff / beta, diff - 0.5 * beta)
    else:
        elem = diff
    if weight is not None:
        elem = elem * weight.astype(jnp.float32)
    if reduction == "mean":
        loss = elem.sum() / (elem.size if avg_factor is None else avg_factor)
    elif reduction == "sum":
        loss = elem.sum()
    else:
        loss = elem
    num_points = pred.shape[-1] // 2
    return loss / num_points * loss_weight


if __name__ == "__main__":
    key = jax.random.PRNGKey(0)
    k1, k2, k3, k4 = jax.random.split(key, 4)

    # SparseDrive-like map shapes: bs=2, 8 lines, 20 points -> last dim 40.
    bs, num_preds, num_points = 2, 8, 20
    shape = (bs, num_preds, num_points * 2)
    pred = jax.random.normal(k1, shape, dtype=jnp.float32)
    target = jax.random.normal(k2, shape, dtype=jnp.float32)
    weight = (jax.random.uniform(k3, shape) > 0.3).astype(jnp.float32)

    # Force the Pallas path even at this small size.
    loss_fn = LinesL1Loss(reduction="mean", loss_weight=1.0, beta=0.5,
                          min_pallas_numel=0)

    out_mean = jax.block_until_ready(loss_fn(pred, target, weight=weight))
    out_sum = jax.block_until_ready(
        loss_fn(pred, target, weight=weight, reduction_override="sum"))
    out_none = jax.block_until_ready(
        loss_fn(pred, target, weight=weight, reduction_override="none"))
    out_avg = jax.block_until_ready(
        loss_fn(pred, target, weight=weight, avg_factor=123.0))
    out_nw = jax.block_until_ready(loss_fn(pred, target))

    assert jnp.allclose(out_mean, _reference(pred, target, weight, 0.5, "mean", 1.0),
                        rtol=1e-5, atol=1e-5)
    assert jnp.allclose(out_sum, _reference(pred, target, weight, 0.5, "sum", 1.0),
                        rtol=1e-5, atol=1e-4)
    assert jnp.allclose(out_none, _reference(pred, target, weight, 0.5, "none", 1.0),
                        rtol=1e-5, atol=1e-5)
    assert jnp.allclose(out_avg, _reference(pred, target, weight, 0.5, "mean", 1.0,
                                            avg_factor=123.0), rtol=1e-5, atol=1e-5)
    assert jnp.allclose(out_nw, _reference(pred, target, None, 0.5, "mean", 1.0),
                        rtol=1e-5, atol=1e-5)

    # Multi-block grid, 2-core split, edge/duplicate masking, compact per-line
    # weight (the (bs, P) mmdet-style weight), narrow no-copy layout (C=40).
    shape2 = (4, 50, 40)
    p2 = jax.random.normal(k4, shape2, dtype=jnp.float32)
    t2 = jax.random.normal(jax.random.fold_in(key, 7), shape2, dtype=jnp.float32)
    w_line = (jax.random.uniform(jax.random.fold_in(key, 11), shape2[:-1]) > 0.5
              ).astype(jnp.float32)                       # shape (4, 50)
    loss_small_tiles = LinesL1Loss(min_pallas_numel=0, max_rows=16)
    out2_mean = jax.block_until_ready(loss_small_tiles(p2, t2, weight=w_line))
    out2_none = jax.block_until_ready(
        loss_small_tiles(p2, t2, weight=w_line, reduction_override="none"))
    assert jnp.allclose(out2_mean,
                        _reference(p2, t2, w_line[..., None], 0.5, "mean", 1.0),
                        rtol=1e-5, atol=1e-5)
    assert jnp.allclose(out2_none,
                        _reference(p2, t2, w_line[..., None], 0.5, "none", 1.0),
                        rtol=1e-5, atol=1e-5)

    # bf16 inputs stay bf16 through the DMA; kernel upcasts to f32 internally.
    pb = pred.astype(jnp.bfloat16)
    tb = target.astype(jnp.bfloat16)
    out_bf16 = jax.block_until_ready(loss_fn(pb, tb))
    assert jnp.allclose(out_bf16, _reference(pb, tb, None, 0.5, "mean", 1.0),
                        rtol=1e-4, atol=1e-4)

    # Tiny-input fast path (default threshold): plain jnp, no pallas_call.
    loss_default = LinesL1Loss()
    out_fast = jax.block_until_ready(loss_default(pred, target, weight=weight))
    assert jnp.allclose(out_fast, _reference(pred, target, weight, 0.5, "mean", 1.0),
                        rtol=1e-5, atol=1e-5)

    print("KERNEL_OK")
</pallas_src>

<mosaic_0001>
module attributes {stable_mosaic.version = 11 : i64} {
  func.func @_sum_kernel(%arg0: i32, %arg1: i32, %arg2: memref<5x128xf32, #tpu.memory_space<vmem>>, %arg3: memref<5x128xf32, #tpu.memory_space<vmem>>, %arg4: memref<5x128xf32, #tpu.memory_space<vmem>>, %arg5: memref<1x5x128xf32, #tpu.memory_space<vmem>>) attributes {dimension_semantics = [#tpu.dimension_semantics<parallel>, #tpu.dimension_semantics<arbitrary>], iteration_bounds = array<i64: 1, 1>, scalar_prefetch = 0 : i64, scratch_operands = 0 : i64, tpu.core_type = #tpu.core_type<tc>, window_params = [{transform_indices = @transform_0, window_bounds = array<i64: 5, 128>}, {transform_indices = @transform_1, window_bounds = array<i64: 5, 128>}, {transform_indices = @transform_2, window_bounds = array<i64: 5, 128>}, {transform_indices = @transform_3, window_bounds = array<i64: 1, 5, 128>}]} {
    %c0_i32 = arith.constant 0 : i32
    %0 = arith.cmpi eq, %arg1, %c0_i32 : i32
    %1 = arith.extui %0 : i1 to i32
    %c0_i32_0 = arith.constant 0 : i32
    %2 = arith.cmpi ne, %1, %c0_i32_0 : i32
    scf.if %2 {
      %cst_14 = arith.constant 0.000000e+00 : f32
      %21 = vector.broadcast %cst_14 : f32 to vector<1x5x128xf32>
      %c0_15 = arith.constant 0 : index
      %c0_16 = arith.constant 0 : index
      %c0_17 = arith.constant 0 : index
      %22 = vector.load %arg5[%c0_15, %c0_16, %c0_17] : memref<1x5x128xf32, #tpu.memory_space<vmem>>, vector<1x5x128xf32>
      tpu.vector_store %arg5[%c0_15, %c0_16, %c0_17], %21 {strides = array<i32>} : memref<1x5x128xf32, #tpu.memory_space<vmem>>, vector<1x5x128xf32>,
    } else {
    }
    %c0 = arith.constant 0 : index
    %c0_1 = arith.constant 0 : index
    %3 = vector.load %arg2[%c0, %c0_1] : memref<5x128xf32, #tpu.memory_space<vmem>>, vector<5x128xf32>
    %c0_2 = arith.constant 0 : index
    %c0_3 = arith.constant 0 : index
    %4 = vector.load %arg3[%c0_2, %c0_3] : memref<5x128xf32, #tpu.memory_space<vmem>>, vector<5x128xf32>
    %5 = arith.subf %3, %4 : vector<5x128xf32>
    %6 = math.absf %5 : vector<5x128xf32>
    %cst = arith.constant 5.000000e-01 : f32
    %7 = vector.broadcast %cst : f32 to vector<5x128xf32>
    %8 = arith.cmpf olt, %6, %7 : vector<5x128xf32>
    %9 = arith.mulf %6, %6 : vector<5x128xf32>
    %cst_4 = arith.constant 1.000000e+00 : f32
    %10 = vector.broadcast %cst_4 : f32 to vector<5x128xf32>
    %11 = arith.mulf %9, %10 : vector<5x128xf32>
    %cst_5 = arith.constant 2.500000e-01 : f32
    %12 = vector.broadcast %cst_5 : f32 to vector<5x128xf32>
    %13 = arith.subf %6, %12 : vector<5x128xf32>
    %14 = arith.select %8, %11, %13 : vector<5x128xi1>, vector<5x128xf32>
    %c0_6 = arith.constant 0 : index
    %c0_7 = arith.constant 0 : index
    %15 = vector.load %arg4[%c0_6, %c0_7] : memref<5x128xf32, #tpu.memory_space<vmem>>, vector<5x128xf32>
    %16 = arith.mulf %14, %15 : vector<5x128xf32>
    %c0_8 = arith.constant 0 : index
    %c0_9 = arith.constant 0 : index
    %c0_10 = arith.constant 0 : index
    %17 = vector.load %arg5[%c0_8, %c0_9, %c0_10] : memref<1x5x128xf32, #tpu.memory_space<vmem>>, vector<1x5x128xf32>
    %18 = vector.shape_cast %16 : vector<5x128xf32> to vector<1x5x128xf32>
    %19 = arith.addf %17, %18 : vector<1x5x128xf32>
    %c0_11 = arith.constant 0 : index
    %c0_12 = arith.constant 0 : index
    %c0_13 = arith.constant 0 : index
    %20 = vector.load %arg5[%c0_11, %c0_12, %c0_13] : memref<1x5x128xf32, #tpu.memory_space<vmem>>, vector<1x5x128xf32>
    tpu.vector_store %arg5[%c0_11, %c0_12, %c0_13], %19 {strides = array<i32>} : memref<1x5x128xf32, #tpu.memory_space<vmem>>, vector<1x5x128xf32>,
    return
  }
  func.func @transform_0(%arg0: i32, %arg1: i32) -> (i32, i32) {
    %c1_i32 = arith.constant 1 : i32
    %0 = arith.muli %arg0, %c1_i32 : i32
    %1 = arith.addi %0, %arg1 : i32
    %c0_i32 = arith.constant 0 : i32
    %2 = arith.minsi %1, %c0_i32 : i32
    %c0_i32_0 = arith.constant 0 : i32
    %c0_i32_1 = arith.constant 0 : i32
    return %2, %c0_i32_0 : i32, i32
  }
  func.func @transform_1(%arg0: i32, %arg1: i32) -> (i32, i32) {
    %c1_i32 = arith.constant 1 : i32
    %0 = arith.muli %arg0, %c1_i32 : i32
    %1 = arith.addi %0, %arg1 : i32
    %c0_i32 = arith.constant 0 : i32
    %2 = arith.minsi %1, %c0_i32 : i32
    %c0_i32_0 = arith.constant 0 : i32
    %c0_i32_1 = arith.constant 0 : i32
    return %2, %c0_i32_0 : i32, i32
  }
  func.func @transform_2(%arg0: i32, %arg1: i32) -> (i32, i32) {
    %c1_i32 = arith.constant 1 : i32
    %0 = arith.muli %arg0, %c1_i32 : i32
    %1 = arith.addi %0, %arg1 : i32
    %c0_i32 = arith.constant 0 : i32
    %2 = arith.minsi %1, %c0_i32 : i32
    %c0_i32_0 = arith.constant 0 : i32
    %c0_i32_1 = arith.constant 0 : i32
    return %2, %c0_i32_0 : i32, i32
  }
  func.func @transform_3(%arg0: i32, %arg1: i32) -> (i32, i32, i32) {
    %c0_i32 = arith.constant 0 : i32
    %c0_i32_0 = arith.constant 0 : i32
    %c0_i32_1 = arith.constant 0 : i32
    return %arg0, %c0_i32, %c0_i32_0 : i32, i32, i32
  }
}

</mosaic_0001>

<bundles_post_ra>
// kernel: tpu_custom_call.1
= control target key start
LH: loop header
LB: loop body
LE: loop exit
PB: predicated region body
PF: predicated region fallthrough
CT: control target
= control target key end

     0   :  { %8 = vsyncpa [#allocation3], 0  ;;  %s247_s0 = inlined_call_operand.hbm [shape: f32[5,128], index: 0, kind: input, shape index: {}]   ;;  %s248_s1 = inlined_call_operand.hbm [shape: f32[5,128], index: 1, kind: input, shape index: {}]   ;;  %s249_s2 = inlined_call_operand.hbm [shape: f32[5,128], index: 2, kind: input, shape index: {}]   ;;  %s250_s3 = inlined_call_operand.vmem [shape: f32[1,5,128], index: 3, kind: output, shape index: {}]  }
   0x1   :  { %9 = vsyncpa [#allocation5], 0  ;;  %s178_s12 = smov [#allocation4]   ;;  %s179_s14 = smov [#allocation2]  }
   0x2   :  { %s36_s13 = sshll.u32 %s178_s12, 4  ;;  %s21_s15 = sshll.u32 %s179_s14, 4  ;;  %s37_s13 = int_to_ptr.vmem [resolvable:$true] %s36_s13  ;;  %s22_s15 = int_to_ptr.vmem [resolvable:$true] %s21_s15 }
   0x3   :  { %s108_s18 = scalar_lea.hbm %s248_s1, 128 }
   0x4   :  { %p109_p0 = scmp.ne.s32.totalorder %s248_s1, %s108_s18  ;;  %p112_p1 = scmp.lt.u32.totalorder %s108_s18, %s248_s1 }
   0x6   :  { %p114_p2 = pnand %p112_p1, %p109_p0 }
   0x8   :  { %117 = shalt.err (!%p114_p2)
}
   0x9   :  { %s118_s23 = scalar_lea.vmem %s37_s13, 128  ;;  %p123_p4 = scmp.lt.s32.totalorder %s37_s13, %s37_s13 }
   0xa   :  { %p119_p3 = scmp.ne.s32.totalorder %s37_s13, %s118_s23  ;;  %p124_p5 = scmp.lt.s32.totalorder %s118_s23, %s118_s23 }
   0xc   :  { %p125_p6 = por %p124_p5, %p123_p4 }
   0xe   :  { %p126_p7 = pnand %p125_p6, %p119_p3 }
  0x10   :  { %129 = shalt.err (!%p126_p7)
}
  0x11   :  { %39 = dma.hbm_to_vmem [thread:$0]  %s248_s1, 128, %s37_s13, [#allocation5]  }
  0x12   :  { %s130_s28 = scalar_lea.hbm %s247_s0, 128 }
  0x13   :  { %p131_p8 = scmp.ne.s32.totalorder %s247_s0, %s130_s28  ;;  %p134_p9 = scmp.lt.u32.totalorder %s130_s28, %s247_s0 }
  0x15   :  { %p136_p10 = pnand %p134_p9, %p131_p8 }
  0x17   :  { %139 = shalt.err (!%p136_p10)
}
  0x18   :  { %s140_s6 = scalar_lea.vmem %s22_s15, 128  ;;  %p145_p12 = scmp.lt.s32.totalorder %s22_s15, %s22_s15 }
  0x19   :  { %p141_p11 = scmp.ne.s32.totalorder %s22_s15, %s140_s6  ;;  %p146_p13 = scmp.lt.s32.totalorder %s140_s6, %s140_s6 }
  0x1b   :  { %p147_p0 = por %p146_p13, %p145_p12 }
  0x1d   :  { %p148_p1 = pnand %p147_p0, %p141_p11 }
  0x1f   :  { %151 = shalt.err (!%p148_p1)
}
  0x20   :  { %24 = dma.hbm_to_vmem [thread:$0]  %s247_s0, 128, %s22_s15, [#allocation3]  }
  0x21   :  { %s180_s8 = smov [#allocation6]   ;;  %s152_s12 = scalar_lea.hbm %s249_s2, 128 }
  0x22   :  { %s51_s9 = sshll.u32 %s180_s8, 4  ;;  %p153_p2 = scmp.ne.s32.totalorder %s249_s2, %s152_s12  ;;  %s52_s9 = int_to_ptr.vmem [resolvable:$true] %s51_s9 }
  0x23   :  { %p156_p3 = scmp.lt.u32.totalorder %s152_s12, %s249_s2 }
  0x25   :  { %p158_p4 = pnand %p156_p3, %p153_p2 }
  0x27   :  { %161 = shalt.err (!%p158_p4)
}
  0x28   :  { %s162_s18 = scalar_lea.vmem %s52_s9, 128  ;;  %p167_p6 = scmp.lt.s32.totalorder %s52_s9, %s52_s9 }
  0x29   :  { %p163_p5 = scmp.ne.s32.totalorder %s52_s9, %s162_s18  ;;  %p168_p7 = scmp.lt.s32.totalorder %s162_s18, %s162_s18 }
  0x2b   :  { %p169_p8 = por %p168_p7, %p167_p6 }
  0x2d   :  { %p170_p9 = pnand %p169_p8, %p163_p5 }
  0x2f   :  { %173 = shalt.err (!%p170_p9)
}
  0x30   :  { %54 = dma.hbm_to_vmem [thread:$0]  %s249_s2, 128, %s52_s9, [#allocation5]  }
  0x31   :  { %174 = dma.done.wait [#allocation3], 128  }
  0x32   :  { %175 = vsyncadd [#allocation3], 4294967168 }
  0x33   :  { %176 = dma.done.wait [#allocation5], 256  }
  0x34   :  { %177 = vsyncadd [#allocation5], 4294967040  ;;  %v181_v0 = vmov 0.0   ;;  %v78_v1 = vld [vmem:[#allocation2] sm:$0x1f] }
  0x35   :  { %77 = vst [vmem:[%s250_s3] sm:$0x1f] %v181_v0  ;;  %v79_v2 = vld [vmem:[#allocation4] sm:$0x1f]  ;;  %v86_v7 = vld [vmem:[#allocation6] sm:$0x1f] }
  0x36   :  { %v80_v3 = vsub.f32 %v78_v1, %v79_v2 }
  0x38   :  { %v81_v4 = vand.u32 2147483647, %v80_v3 }
  0x3a   :  { %vm82_vm0 = vcmp.lt.f32.partialorder %v81_v4, 0.5  ;;  %v83_v5 = vmul.f32 %v81_v4, %v81_v4  ;;  %v103_v6 = vadd.f32 -0.25, %v81_v4 }
  0x3c   :  { %v85_v8 = vsel %vm82_vm0, %v83_v5, %v103_v6  ;;  %v88_v9 = vld [vmem:[%s250_s3] sm:$0x1f] }
  0x3d   :  { %v87_v10 = vmul.f32 %v86_v7, %v85_v8 }
  0x3f   :  { %v89_v11 = vadd.f32 %v88_v9, %v87_v10 }
  0x41   :  { %90 = vst [vmem:[%s250_s3] sm:$0x1f] %v89_v11 }
  0x42   :  { %95 = vsyncpa [#allocation3], 1 }
  0x43   :  { %96 = vsyncpa [#allocation5], 1 }

</bundles_post_ra>
